<compile_context>
chip_gen: v6e
topology: v6e:2x2x1
jax: 0.10.0
libtpu: 0.0.40
codegen_flags: <defaults>
</compile_context>

<pallas_src>
import jax
import jax.numpy as jnp
from jax.experimental import pallas as pl
from jax.experimental.pallas import tpu as pltpu


def _convt_fused_kernel(x_ref, w_ref, b_ref, r_ref, o_ref):
    # (TM, Cin) @ (Cin, 4*Cout) on the MXU with f32 accumulation, then fused
    # bias add + residual (x2) add -> (TM, 4*Cout).
    acc = jnp.dot(x_ref[...], w_ref[...], preferred_element_type=jnp.float32)
    acc = acc + b_ref[...].astype(jnp.float32) + r_ref[...].astype(jnp.float32)
    o_ref[...] = acc.astype(o_ref.dtype)


def _round_up(x, m):
    return -(-x // m) * m


def _pick_tm(m, cin, cout, itemsize):
    # Per-row footprint across double-buffered x1 / residual / output tiles.
    per_row = 2 * itemsize * (cin + 4 * cout + 4 * cout)
    budget = 12 << 20  # ~12 MiB of pipelined tiles: fits v5e/v6e/v7x VMEM comfortably
    tm = int(budget // max(per_row, 1))
    tm = max(8, min(tm, 2048))
    tm -= tm % 8
    if tm >= m:
        return _round_up(m, 8)  # single tile covers all rows
    return tm


def up_forward(x1, x2, weight, bias, *, tm=None, matmul_dtype=None):
    """Matches `up(in_ch).forward(x1, x2)` (NCHW in / NCHW out).

    x1:     (N, Cin, H, W)
    x2:     (N, Cout, H2, W2), Cout = Cin // 2
    weight: (Cin, Cout, 2, 2)   PyTorch ConvTranspose2d layout
    bias:   (Cout,)
    """
    N, Cin, H, W = x1.shape
    Cout = weight.shape[1]
    H2, W2 = x2.shape[2], x2.shape[3]
    Hu, Wu = 2 * H, 2 * W
    diffY, diffX = H2 - Hu, W2 - Wu
    # TODO(synk): negative diff (F.pad crop) path not implemented; standard UNet has x2 >= upsampled x1.
    assert diffY >= 0 and diffX >= 0, "x2 spatial dims must be >= 2*x1 spatial dims"
    offY, offX = diffY // 2, diffX // 2

    out_dtype = x2.dtype
    M = N * H * W
    K4 = 4 * Cout

    # x1 as channel-last rows; weight (Cin,Cout,kh,kw) -> (Cin, kh*kw*Cout);
    # bias repeated per tap (oc innermost, matching the weight column order).
    x1_flat = jnp.transpose(x1, (0, 2, 3, 1)).reshape(M, Cin)
    w_mat = jnp.transpose(weight, (0, 2, 3, 1)).reshape(Cin, K4)
    b_mat = jnp.tile(bias, 4).reshape(1, K4)

    if matmul_dtype is not None:  # e.g. jnp.bfloat16 for deep layers on v6e/v7x
        x1_flat = x1_flat.astype(matmul_dtype)
        w_mat = w_mat.astype(matmul_dtype)

    # The slice of x2 overlapping the upsampled x1, rearranged once into the
    # same (row, tap-major column) layout as the matmul output so the residual
    # add fuses into the matmul kernel.
    x2_nhwc = jnp.transpose(x2, (0, 2, 3, 1))                       # (N, H2, W2, Cout)
    x2_int = x2_nhwc[:, offY:offY + Hu, offX:offX + Wu, :]          # (N, 2H, 2W, Cout)
    x2_taps = jnp.transpose(
        x2_int.reshape(N, H, 2, W, 2, Cout), (0, 1, 3, 2, 4, 5)
    ).reshape(M, K4)

    itemsize = jnp.dtype(x1_flat.dtype).itemsize
    if tm is None:
        tm = _pick_tm(M, Cin, Cout, itemsize)
    tm = max(8, tm - tm % 8)
    M_pad = _round_up(M, tm)
    if M_pad != M:
        x1_flat = jnp.pad(x1_flat, ((0, M_pad - M), (0, 0)))
        x2_taps = jnp.pad(x2_taps, ((0, M_pad - M), (0, 0)))

    grid = (M_pad // tm,)

    # VMEM budget: double-buffered tiles + resident weight/bias + headroom.
    tiles_bytes = 2 * tm * (Cin + 2 * K4) * itemsize + 2 * Cin * K4 * itemsize
    vmem_limit = int(min(max(tiles_bytes + (8 << 20), 32 << 20), 56 << 20))

    bytes_accessed = itemsize * (M_pad * Cin + Cin * K4 + K4 + 2 * M_pad * K4)
    cost = pl.CostEstimate(
        flops=2 * M_pad * Cin * K4,
        transcendentals=0,
        bytes_accessed=bytes_accessed,
    )

    out_mat = pl.pallas_call(
        _convt_fused_kernel,
        grid=grid,
        in_specs=[
            pl.BlockSpec((tm, Cin), lambda i: (i, 0)),   # x1 rows, pipelined
            pl.BlockSpec((Cin, K4), lambda i: (0, 0)),   # weight, resident
            pl.BlockSpec((1, K4), lambda i: (0, 0)),     # bias, resident
            pl.BlockSpec((tm, K4), lambda i: (i, 0)),    # x2 residual rows, pipelined
        ],
        out_specs=pl.BlockSpec((tm, K4), lambda i: (i, 0)),
        out_shape=jax.ShapeDtypeStruct((M_pad, K4), out_dtype),
        compiler_params=pltpu.CompilerParams(
            dimension_semantics=("parallel",),
            vmem_limit_bytes=vmem_limit,
        ),
        cost_estimate=cost,
    )(x1_flat, w_mat, b_mat, x2_taps)

    out_mat = out_mat[:M]
    # Interleave the 2x2 taps into the upsampled grid: (N, 2H, 2W, Cout) -> NCHW.
    fused = jnp.transpose(
        out_mat.reshape(N, H, W, 2, 2, Cout), (0, 1, 3, 2, 4, 5)
    ).reshape(N, Hu, Wu, Cout)
    fused_nchw = jnp.transpose(fused, (0, 3, 1, 2))

    if diffY == 0 and diffX == 0:
        return fused_nchw  # no pad, no extra copy of x2
    # Border region: padded x1 contributes zero there, so the output is just x2.
    return jax.lax.dynamic_update_slice(x2, fused_nchw, (0, 0, offY, offX))


def _reference(x1, x2, weight, bias):
    """Pure-JAX reference for ConvTranspose2d(k=2, s=2) + pad + add."""
    N, Cin, H, W = x1.shape
    Cout = weight.shape[1]
    y = jnp.einsum("nchw,cokl->nohwkl", x1, weight)
    y = jnp.transpose(y, (0, 1, 2, 4, 3, 5)).reshape(N, Cout, 2 * H, 2 * W)
    y = y + bias[None, :, None, None]
    H2, W2 = x2.shape[2], x2.shape[3]
    dY, dX = H2 - 2 * H, W2 - 2 * W
    y = jnp.pad(y, ((0, 0), (0, 0), (dY // 2, dY - dY // 2), (dX // 2, dX - dX // 2)))
    return x2 + y


if __name__ == "__main__":
    key = jax.random.PRNGKey(0)
    k1, k2, kw, kb, k3, k4, kw2, kb2 = jax.random.split(key, 8)

    # Case 1: diff == 0 (pad skipped), single-tile grid.
    in_ch, out_ch = 4, 2
    N, H, W = 2, 8, 8
    x1 = jax.random.normal(k1, (N, in_ch, H, W), dtype=jnp.float32)
    x2 = jax.random.normal(k2, (N, out_ch, 2 * H, 2 * W), dtype=jnp.float32)
    weight = 0.5 * jax.random.normal(kw, (in_ch, out_ch, 2, 2), dtype=jnp.float32)
    bias = 0.1 * jax.random.normal(kb, (out_ch,), dtype=jnp.float32)
    out = jax.block_until_ready(up_forward(x1, x2, weight, bias))
    ref = _reference(x1, x2, weight, bias)
    assert out.shape == ref.shape == (N, out_ch, 2 * H, 2 * W)
    assert jnp.allclose(out, ref, atol=1e-5, rtol=1e-5), "case 1 mismatch vs reference"

    # Case 2: nonzero pad + multi-tile grid (forced small tm) + ragged M.
    in_ch, out_ch = 8, 4
    N, H, W = 2, 10, 10
    H2, W2 = 2 * H + 3, 2 * W + 2
    x1 = jax.random.normal(k3, (N, in_ch, H, W), dtype=jnp.float32)
    x2 = jax.random.normal(k4, (N, out_ch, H2, W2), dtype=jnp.float32)
    weight = 0.5 * jax.random.normal(kw2, (in_ch, out_ch, 2, 2), dtype=jnp.float32)
    bias = 0.1 * jax.random.normal(kb2, (out_ch,), dtype=jnp.float32)
    out = jax.block_until_ready(up_forward(x1, x2, weight, bias, tm=64))
    ref = _reference(x1, x2, weight, bias)
    assert out.shape == ref.shape == (N, out_ch, H2, W2)
    assert jnp.allclose(out, ref, atol=1e-5, rtol=1e-5), "case 2 mismatch vs reference"

    print("KERNEL_OK")
</pallas_src>

<mosaic_0001>
module attributes {stable_mosaic.version = 11 : i64} {
  func.func @_convt_fused_kernel(%arg0: i32, %arg1: memref<128x4xf32, #tpu.memory_space<vmem>>, %arg2: memref<4x8xf32, #tpu.memory_space<vmem>>, %arg3: memref<1x8xf32, #tpu.memory_space<vmem>>, %arg4: memref<128x8xf32, #tpu.memory_space<vmem>>, %arg5: memref<128x8xf32, #tpu.memory_space<vmem>>) attributes {dimension_semantics = [#tpu.dimension_semantics<parallel>], iteration_bounds = array<i64: 1>, scalar_prefetch = 0 : i64, scratch_operands = 0 : i64, tpu.core_type = #tpu.core_type<tc>, window_params = [{transform_indices = @transform_0, window_bounds = array<i64: 128, 4>}, {pipeline_mode = #tpu.pipeline_mode<synchronous>, transform_indices = @transform_1, window_bounds = array<i64: 4, 8>}, {pipeline_mode = #tpu.pipeline_mode<synchronous>, transform_indices = @transform_2, window_bounds = array<i64: 1, 8>}, {transform_indices = @transform_3, window_bounds = array<i64: 128, 8>}, {transform_indices = @transform_4, window_bounds = array<i64: 128, 8>}]} {
    %c0 = arith.constant 0 : index
    %c0_0 = arith.constant 0 : index
    %0 = vector.load %arg1[%c0, %c0_0] : memref<128x4xf32, #tpu.memory_space<vmem>>, vector<128x4xf32>
    %c0_1 = arith.constant 0 : index
    %c0_2 = arith.constant 0 : index
    %1 = vector.load %arg2[%c0_1, %c0_2] : memref<4x8xf32, #tpu.memory_space<vmem>>, vector<4x8xf32>
    %cst = arith.constant dense<0.000000e+00> : vector<128x8xf32>
    %2 = tpu.matmul %0, %1, %cst {dimension_numbers = #tpu.dot_dimension_numbers<[1], [0], [0], [1], [0, 0, 1, 1], [], []>} : vector<128x4xf32>, vector<4x8xf32>, vector<128x8xf32> -> vector<128x8xf32>
    %c0_3 = arith.constant 0 : index
    %c0_4 = arith.constant 0 : index
    %3 = vector.load %arg3[%c0_3, %c0_4] : memref<1x8xf32, #tpu.memory_space<vmem>>, vector<1x8xf32>
    %4 = vector.broadcast %3 : vector<1x8xf32> to vector<128x8xf32>
    %5 = arith.addf %2, %4 : vector<128x8xf32>
    %c0_5 = arith.constant 0 : index
    %c0_6 = arith.constant 0 : index
    %6 = vector.load %arg4[%c0_5, %c0_6] : memref<128x8xf32, #tpu.memory_space<vmem>>, vector<128x8xf32>
    %7 = arith.addf %5, %6 : vector<128x8xf32>
    %c0_7 = arith.constant 0 : index
    %c0_8 = arith.constant 0 : index
    %8 = vector.load %arg5[%c0_7, %c0_8] : memref<128x8xf32, #tpu.memory_space<vmem>>, vector<128x8xf32>
    tpu.vector_store %arg5[%c0_7, %c0_8], %7 {strides = array<i32>} : memref<128x8xf32, #tpu.memory_space<vmem>>, vector<128x8xf32>,
    return
  }
  func.func @transform_0(%arg0: i32) -> (i32, i32) {
    %c0_i32 = arith.constant 0 : i32
    %c0_i32_0 = arith.constant 0 : i32
    return %arg0, %c0_i32 : i32, i32
  }
  func.func @transform_1(%arg0: i32) -> (i32, i32) {
    %c0_i32 = arith.constant 0 : i32
    %c0_i32_0 = arith.constant 0 : i32
    %c0_i32_1 = arith.constant 0 : i32
    return %c0_i32, %c0_i32_0 : i32, i32
  }
  func.func @transform_2(%arg0: i32) -> (i32, i32) {
    %c0_i32 = arith.constant 0 : i32
    %c0_i32_0 = arith.constant 0 : i32
    %c0_i32_1 = arith.constant 0 : i32
    return %c0_i32, %c0_i32_0 : i32, i32
  }
  func.func @transform_3(%arg0: i32) -> (i32, i32) {
    %c0_i32 = arith.constant 0 : i32
    %c0_i32_0 = arith.constant 0 : i32
    return %arg0, %c0_i32 : i32, i32
  }
  func.func @transform_4(%arg0: i32) -> (i32, i32) {
    %c0_i32 = arith.constant 0 : i32
    %c0_i32_0 = arith.constant 0 : i32
    return %arg0, %c0_i32 : i32, i32
  }
}

</mosaic_0001>

<bundles_post_ra>
// kernel: tpu_custom_call.1
= control target key start
LH: loop header
LB: loop body
LE: loop exit
PB: predicated region body
PF: predicated region fallthrough
CT: control target
= control target key end

     0   :  { %vm90_vm0 = vcmask 1043456   ;;  %vm41_vm1 = vcmask 31744   ;;  %vm271_vm2 = vcmask 64512   ;;  %s580_s1 = inlined_call_operand.vmem [shape: f32[4,8], index: 1, kind: input, shape index: {}]   ;;  %s581_s0 = inlined_call_operand.vmem [shape: f32[128,4], index: 0, kind: input, shape index: {}]   ;;  %s582_s2 = inlined_call_operand.vmem [shape: f32[1,8], index: 2, kind: input, shape index: {}]   ;;  %s583_s3 = inlined_call_operand.vmem [shape: f32[128,8], index: 3, kind: input, shape index: {}]   ;;  %s584_s4 = inlined_call_operand.vmem [shape: f32[128,8], index: 4, kind: output, shape index: {}]  }
   0x1   :  { %v33_v0 = vld [vmem:[%s580_s1] sm:$0xf]  ;;  %v18_v3 = vld [vmem:[%s581_s0 + $0x8] sm:$0xff]  ;;  %v19_v5 = vld [vmem:[%s581_s0 + $0x10] sm:$0xff] }
   0x2   :  { %v17_v1 = vld [vmem:[%s581_s0] sm:$0xff]  ;;  %327 = vmatprep.subr.msk.mxu0 %vm90_vm0, %v33_v0  ;;  %353 = vmatprep.subr.msk.mxu1 %vm90_vm0, %v33_v0  ;;  %v26_v4 = vld [vmem:[%s581_s0 + $0x48] sm:$0xff]  ;;  %v27_v6 = vld [vmem:[%s581_s0 + $0x50] sm:$0xff] }
   0x3   :  { %v25_v2 = vld [vmem:[%s581_s0 + $0x40] sm:$0xff]  ;;  %328 = vmatpush3.msk.msra.mxu0 %vm90_vm0, %v33_v0  ;;  %354 = vmatpush3.msk.msra.mxu1 %vm90_vm0, %v33_v0  ;;  %v20_v7 = vld [vmem:[%s581_s0 + $0x18] sm:$0xff]  ;;  %v22_v11 = vld [vmem:[%s581_s0 + $0x28] sm:$0xff] }
   0x4   :  { %329 = vmatprep.mubr.msk.f32.mxu0 %vm41_vm1, %v17_v1  ;;  %341 = vmatprep.mubr.msk.f32.mxu1 %vm41_vm1, %v25_v2  ;;  %v28_v8 = vld [vmem:[%s581_s0 + $0x58] sm:$0xff]  ;;  %v21_v9 = vld [vmem:[%s581_s0 + $0x20] sm:$0xff]  ;;  %v30_v12 = vld [vmem:[%s581_s0 + $0x68] sm:$0xff] }
   0x5   :  { %330 = vmatmul.mubr.msk.f32.vlgmr.msra.gmra.mxu0 %vm41_vm1, %v18_v3  ;;  %342 = vmatmul.mubr.msk.f32.vlgmr.msra.gmra.mxu1 %vm41_vm1, %v26_v4  ;;  %v29_v10 = vld [vmem:[%s581_s0 + $0x60] sm:$0xff]  ;;  %v23_v13 = vld [vmem:[%s581_s0 + $0x30] sm:$0xff]  ;;  %v24_v15 = vld [vmem:[%s581_s0 + $0x38] sm:$0xff] }
   0x6   :  { %332 = vmatprep.mubr.msk.f32.mxu0 %vm41_vm1, %v19_v5  ;;  %344 = vmatprep.mubr.msk.f32.mxu1 %vm41_vm1, %v27_v6  ;;  %v31_v14 = vld [vmem:[%s581_s0 + $0x70] sm:$0xff]  ;;  %v32_v16 = vld [vmem:[%s581_s0 + $0x78] sm:$0xff]  ;;  %v450_v17 = vld [vmem:[%s582_s2] ss:$0 sm:$0xff] }
   0x7   :  { %v240_v19 = vld [vmem:[%s583_s3 + $0x8] sm:$0xff]  ;;  %v239_v25 = vld [vmem:[%s583_s3] sm:$0xff]  ;;  %v242_v33 = vld [vmem:[%s583_s3 + $0x18] sm:$0xff] }
   0x8   :  { %v248_v21 = vld [vmem:[%s583_s3 + $0x48] sm:$0xff]  ;;  %v247_v27 = vld [vmem:[%s583_s3 + $0x40] sm:$0xff]  ;;  %v250_v35 = vld [vmem:[%s583_s3 + $0x58] sm:$0xff] }
   0x9   :  { %333 = vmatmul.mubr.msk.f32.gmra.mxu0 %vm41_vm1, %v20_v7  ;;  %345 = vmatmul.mubr.msk.f32.gmra.mxu1 %vm41_vm1, %v28_v8  ;;  %v241_v41 = vld [vmem:[%s583_s3 + $0x10] sm:$0xff]  ;;  %v244_v49 = vld [vmem:[%s583_s3 + $0x28] sm:$0xff]  ;;  %v243_v57 = vld [vmem:[%s583_s3 + $0x20] sm:$0xff] }
   0xa   :  { %335 = vmatprep.mubr.msk.f32.mxu0 %vm41_vm1, %v21_v9  ;;  %347 = vmatprep.mubr.msk.f32.mxu1 %vm41_vm1, %v29_v10  ;;  %v249_v43 = vld [vmem:[%s583_s3 + $0x50] sm:$0xff]  ;;  %v252_v51 = vld [vmem:[%s583_s3 + $0x68] sm:$0xff]  ;;  %v251_v59 = vld [vmem:[%s583_s3 + $0x60] sm:$0xff] }
   0xb   :  { %v246_v1 = vld [vmem:[%s583_s3 + $0x38] sm:$0xff]  ;;  %v245_v9 = vld [vmem:[%s583_s3 + $0x30] sm:$0xff] }
   0xc   :  { %v254_v3 = vld [vmem:[%s583_s3 + $0x78] sm:$0xff] }
   0xd   :  { %336 = vmatmul.mubr.msk.f32.gmra.mxu0 %vm41_vm1, %v22_v11  ;;  %348 = vmatmul.mubr.msk.f32.gmra.mxu1 %vm41_vm1, %v30_v12  ;;  %v253_v11 = vld [vmem:[%s583_s3 + $0x70] sm:$0xff] }
   0xe   :  { %338 = vmatprep.mubr.msk.f32.mxu0 %vm41_vm1, %v23_v13  ;;  %350 = vmatprep.mubr.msk.f32.mxu1 %vm41_vm1, %v31_v14 }
  0x11   :  { %339 = vmatmul.mubr.msk.f32.gmra.mxu0 %vm41_vm1, %v24_v15  ;;  %351 = vmatmul.mubr.msk.f32.gmra.mxu1 %vm41_vm1, %v32_v16 }
  0xc5   :  { %v331_v18 = vpop.f32.mrf.mxu0  ;;  %v343_v20 = vpop.f32.mrf.mxu1 }
  0xc6   :  { %v166_v22 = vadd.f32 %v331_v18, %v450_v17  ;;  %v206_v23 = vadd.f32 %v343_v20, %v450_v17 }
  0xc7   :  { %v160_v24 = vpop.f32.mrf.mxu0  ;;  %v200_v26 = vpop.f32.mrf.mxu1 }
  0xc8   :  { %v256_v28 = vadd.f32 %v240_v19, %v166_v22  ;;  %v264_v29 = vadd.f32 %v248_v21, %v206_v23  ;;  %v161_v30 = vadd.f32 %v450_v17, %v160_v24  ;;  %v201_v31 = vadd.f32 %v450_v17, %v200_v26 }
  0xc9   :  { %v334_v32 = vpop.f32.mrf.mxu0  ;;  %v346_v34 = vpop.f32.mrf.mxu1 }
  0xca   :  { %273 = vst.msk [vmem:[%s584_s4 + $0x8] sm:$0xff] %vm271_vm2, %v256_v28  ;;  %281 = vst.msk [vmem:[%s584_s4 + $0x48] sm:$0xff] %vm271_vm2, %v264_v29  ;;  %v255_v36 = vadd.f32 %v239_v25, %v161_v30  ;;  %v263_v37 = vadd.f32 %v247_v27, %v201_v31  ;;  %v176_v38 = vadd.f32 %v334_v32, %v450_v17 }
  0xcb   :  { %v216_v39 = vadd.f32 %v346_v34, %v450_v17  ;;  %v170_v40 = vpop.f32.mrf.mxu0  ;;  %v210_v42 = vpop.f32.mrf.mxu1 }
  0xcc   :  { %272 = vst.msk [vmem:[%s584_s4] sm:$0xff] %vm271_vm2, %v255_v36  ;;  %280 = vst.msk [vmem:[%s584_s4 + $0x40] sm:$0xff] %vm271_vm2, %v263_v37  ;;  %v258_v44 = vadd.f32 %v242_v33, %v176_v38  ;;  %v171_v46 = vadd.f32 %v450_v17, %v170_v40  ;;  %v211_v47 = vadd.f32 %v450_v17, %v210_v42 }
  0xcd   :  { %v266_v45 = vadd.f32 %v250_v35, %v216_v39  ;;  %v337_v48 = vpop.f32.mrf.mxu0  ;;  %v349_v50 = vpop.f32.mrf.mxu1 }
  0xce   :  { %275 = vst.msk [vmem:[%s584_s4 + $0x18] sm:$0xff] %vm271_vm2, %v258_v44  ;;  %v257_v52 = vadd.f32 %v241_v41, %v171_v46  ;;  %v265_v53 = vadd.f32 %v249_v43, %v211_v47  ;;  %v186_v54 = vadd.f32 %v337_v48, %v450_v17  ;;  %v226_v55 = vadd.f32 %v349_v50, %v450_v17 }
  0xcf   :  { %283 = vst.msk [vmem:[%s584_s4 + $0x58] sm:$0xff] %vm271_vm2, %v266_v45  ;;  %v180_v56 = vpop.f32.mrf.mxu0  ;;  %v220_v58 = vpop.f32.mrf.mxu1 }
  0xd0   :  { %274 = vst.msk [vmem:[%s584_s4 + $0x10] sm:$0xff] %vm271_vm2, %v257_v52  ;;  %282 = vst.msk [vmem:[%s584_s4 + $0x50] sm:$0xff] %vm271_vm2, %v265_v53  ;;  %v260_v60 = vadd.f32 %v244_v49, %v186_v54  ;;  %v268_v61 = vadd.f32 %v252_v51, %v226_v55  ;;  %v181_v62 = vadd.f32 %v450_v17, %v180_v56 }
  0xd1   :  { %v221_v63 = vadd.f32 %v450_v17, %v220_v58  ;;  %v340_v0 = vpop.f32.mrf.mxu0  ;;  %v352_v2 = vpop.f32.mrf.mxu1 }
  0xd2   :  { %277 = vst.msk [vmem:[%s584_s4 + $0x28] sm:$0xff] %vm271_vm2, %v260_v60  ;;  %285 = vst.msk [vmem:[%s584_s4 + $0x68] sm:$0xff] %vm271_vm2, %v268_v61  ;;  %v259_v4 = vadd.f32 %v243_v57, %v181_v62  ;;  %v196_v6 = vadd.f32 %v340_v0, %v450_v17  ;;  %v236_v7 = vadd.f32 %v352_v2, %v450_v17 }
  0xd3   :  { %v267_v5 = vadd.f32 %v251_v59, %v221_v63  ;;  %v190_v8 = vpop.f32.mrf.mxu0  ;;  %v230_v10 = vpop.f32.mrf.mxu1 }
  0xd4   :  { %276 = vst.msk [vmem:[%s584_s4 + $0x20] sm:$0xff] %vm271_vm2, %v259_v4  ;;  %v262_v12 = vadd.f32 %v246_v1, %v196_v6  ;;  %v270_v13 = vadd.f32 %v254_v3, %v236_v7  ;;  %v191_v14 = vadd.f32 %v450_v17, %v190_v8  ;;  %v231_v15 = vadd.f32 %v450_v17, %v230_v10 }
  0xd5   :  { %284 = vst.msk [vmem:[%s584_s4 + $0x60] sm:$0xff] %vm271_vm2, %v267_v5 }
  0xd6   :  { %279 = vst.msk [vmem:[%s584_s4 + $0x38] sm:$0xff] %vm271_vm2, %v262_v12  ;;  %287 = vst.msk [vmem:[%s584_s4 + $0x78] sm:$0xff] %vm271_vm2, %v270_v13  ;;  %v261_v16 = vadd.f32 %v245_v9, %v191_v14  ;;  %v269_v18 = vadd.f32 %v253_v11, %v231_v15 }
  0xd8   :  { %278 = vst.msk [vmem:[%s584_s4 + $0x30] sm:$0xff] %vm271_vm2, %v261_v16  ;;  %286 = vst.msk [vmem:[%s584_s4 + $0x70] sm:$0xff] %vm271_vm2, %v269_v18 }

</bundles_post_ra>
